<compile_context>
chip_gen: v7x
topology: tpu7x:2x2x1
jax: 0.10.0
libtpu: 0.0.40
codegen_flags: <defaults>
</compile_context>

<pallas_src>
import numpy as np
import jax
import jax.numpy as jnp
from jax.experimental import pallas as pl
from jax.experimental.pallas import tpu as pltpu


# ----------------------------------------------------------------------------
# Kernel factory: one grid step processes a (block_n, d_in) row block of xi and
# writes one merged (block_n, 2*n_freq_p + d_in) output block.
# ----------------------------------------------------------------------------
def _make_kernel(d_in, n_freq_p, tile_w, n_tiles):
    use_fma = d_in <= 16  # MXU <10-25% utilized below K~16-32; VPU FMAs win.

    def kernel(nact_ref, xi_ref, bt_ref, mask_ref, out_ref):
        xi = xi_ref[...]                        # (bn, d_in)
        bn = xi.shape[0]
        xi_f = xi.astype(jnp.float32)
        nact = nact_ref[0]                      # active frequency tiles (SMEM)

        if use_fma:
            # Hoist the per-column lane broadcasts once per step (JAX does not
            # CSE broadcast_in_dim across the tile loop).
            xcols = [jnp.broadcast_to(xi_f[:, k:k + 1], (bn, tile_w))
                     for k in range(d_in)]

        for t in range(n_tiles):
            lo = t * tile_w

            @pl.when(t < nact)
            def _compute(lo=lo):
                bt_t = bt_ref[:, lo:lo + tile_w]            # (d_in, tile_w)
                if use_fma:
                    y = xcols[0] * bt_t[0:1, :]
                    for k in range(1, d_in):
                        y = y + xcols[k] * bt_t[k:k + 1, :]
                else:
                    y = jnp.dot(xi_f, bt_t,
                                preferred_element_type=jnp.float32)
                # Hoisted mask broadcast, reused for both sin and cos.
                mb = jnp.broadcast_to(mask_ref[:, lo:lo + tile_w], (bn, tile_w))
                out_ref[:, lo:lo + tile_w] = \
                    (jnp.sin(y) * mb).astype(out_ref.dtype)
                out_ref[:, n_freq_p + lo:n_freq_p + lo + tile_w] = \
                    (jnp.cos(y) * mb).astype(out_ref.dtype)

            @pl.when(t >= nact)
            def _zeros(lo=lo):
                # Masked-out tiles must be exact zeros (sin*0 / cos*0).
                z = jnp.zeros((bn, tile_w), dtype=out_ref.dtype)
                out_ref[:, lo:lo + tile_w] = z
                out_ref[:, n_freq_p + lo:n_freq_p + lo + tile_w] = z

        # xi passthrough columns (tiny masked store at the tail of the block).
        out_ref[:, 2 * n_freq_p:] = xi.astype(out_ref.dtype)

    return kernel


# ----------------------------------------------------------------------------
# Preparation (do once per B / mask update, reuse across forward calls)
# ----------------------------------------------------------------------------
def prepare_input_mapping(Bmat, mask, compute_dtype=jnp.float32):
    """Pad/transpose B, pad mask, and compute the active-tile count once."""
    n_freq, d_in = Bmat.shape
    if n_freq % 128 == 0 or n_freq < 128:
        n_freq_p = n_freq            # already lane-aligned, or too small to pad
    else:
        n_freq_p = ((n_freq + 127) // 128) * 128
    tile_w = 128 if n_freq_p % 128 == 0 else n_freq_p
    n_tiles = n_freq_p // tile_w

    Bt = jnp.zeros((d_in, n_freq_p), dtype=compute_dtype)
    Bt = Bt.at[:, :n_freq].set(Bmat.T.astype(compute_dtype))       # B^T, padded
    mask_p = jnp.zeros((1, n_freq_p), dtype=compute_dtype)
    mask_p = mask_p.at[:, :n_freq].set(mask.astype(compute_dtype))

    # Active tiles = (index of last tile containing a nonzero mask) + 1.
    tile_has = jnp.any(mask_p.reshape(n_tiles, tile_w) != 0, axis=1)
    nact = jnp.max(jnp.where(tile_has, jnp.arange(1, n_tiles + 1), 0))
    nact = nact.astype(jnp.int32).reshape((1,))

    return dict(Bt=Bt, mask_p=mask_p, nact=nact, d_in=d_in, n_freq=n_freq,
                n_freq_p=n_freq_p, tile_w=tile_w, n_tiles=n_tiles)


# ----------------------------------------------------------------------------
# Row-block sizing: VMEM-aware, >=2 grid steps when possible, multiple of 8.
# ----------------------------------------------------------------------------
_VMEM_BLOCK_BUDGET = 18 * 1024 * 1024   # conservative per-block budget


def _choose_block_n(N, w_out, n_freq_p, d_in, out_bytes, requested=None):
    n_ceil8 = max(8, ((N + 7) // 8) * 8)
    if requested is not None:
        bn = max(8, ((int(requested) + 7) // 8) * 8)     # enforce (8,128) rule
        return min(bn, n_ceil8)
    per_row = (2 * w_out * out_bytes        # double-buffered output block
               + 2 * d_in * 4               # double-buffered xi block
               + 4 * n_freq_p * 4)          # y / sin / cos / broadcast temps
    bn = _VMEM_BLOCK_BUDGET // max(per_row, 1)
    bn = max(8, min(1024, (bn // 8) * 8))
    # Keep >=2 grid steps so megacore (v7x) sharding + pipelining have work.
    if bn >= n_ceil8 and n_ceil8 > 8:
        bn = max(8, ((n_ceil8 // 2 + 7) // 8) * 8)
    return min(bn, n_ceil8)


# ----------------------------------------------------------------------------
# Forward
# ----------------------------------------------------------------------------
def input_mapping_apply(xi, prep, *, block_n=None, out_dtype=None,
                        return_padded=False):
    """Apply a prepared InputMapping to xi.

    Returns (N, 2*n_freq + d_in) matching the PyTorch module, unless
    return_padded=True, in which case the raw (n_pad, 2*n_freq_p + d_in)
    kernel slab is returned with no post-kernel copy at all (padded frequency
    columns are exact zeros).
    """
    N, d_in = xi.shape
    assert d_in == prep["d_in"], "xi feature dim does not match B"
    n_freq, n_freq_p = prep["n_freq"], prep["n_freq_p"]
    tile_w, n_tiles = prep["tile_w"], prep["n_tiles"]
    out_dtype = xi.dtype if out_dtype is None else out_dtype

    w_out = 2 * n_freq_p + d_in
    out_bytes = jnp.dtype(out_dtype).itemsize
    bn = _choose_block_n(N, w_out, n_freq_p, d_in, out_bytes, block_n)
    n_pad = ((N + bn - 1) // bn) * bn
    xi_p = xi if n_pad == N else jnp.pad(xi, ((0, n_pad - N), (0, 0)))

    # Explicit VMEM limit sized from the actual per-block footprint.
    est = (2 * bn * w_out * out_bytes + 2 * bn * d_in * 4
           + 2 * (d_in + 1) * n_freq_p * 4 + 4 * bn * n_freq_p * 4)
    vmem_limit = int(min(56 * 2**20, max(32 * 2**20, 2 * est)))

    kernel = _make_kernel(d_in, n_freq_p, tile_w, n_tiles)
    out = pl.pallas_call(
        kernel,
        out_shape=jax.ShapeDtypeStruct((n_pad, w_out), out_dtype),
        grid_spec=pltpu.PrefetchScalarGridSpec(
            num_scalar_prefetch=1,                 # nact -> SMEM
            grid=(n_pad // bn,),
            in_specs=[
                pl.BlockSpec((bn, d_in), lambda i, nact: (i, 0)),        # xi
                pl.BlockSpec((d_in, n_freq_p), lambda i, nact: (0, 0)),  # B^T
                pl.BlockSpec((1, n_freq_p), lambda i, nact: (0, 0)),     # mask
            ],
            out_specs=pl.BlockSpec((bn, w_out), lambda i, nact: (i, 0)),
        ),
        compiler_params=pltpu.CompilerParams(
            dimension_semantics=("parallel",),
            vmem_limit_bytes=vmem_limit,
        ),
    )(prep["nact"], xi_p, prep["Bt"], prep["mask_p"])

    if return_padded:
        return out
    if n_freq_p == n_freq:
        return out if n_pad == N else out[:N]          # no frequency padding
    o = out if n_pad == N else out[:N]
    return jnp.concatenate(
        [o[:, :n_freq], o[:, n_freq_p:n_freq_p + n_freq], o[:, 2 * n_freq_p:]],
        axis=-1,
    )


def input_mapping_forward(xi, Bmat, mask, *, block_n=None, out_dtype=None):
    """Convenience wrapper: prepare + apply (prefer caching prepare())."""
    return input_mapping_apply(xi, prepare_input_mapping(Bmat, mask),
                               block_n=block_n, out_dtype=out_dtype)


# ----------------------------------------------------------------------------
# Parameter construction mirroring InputMapping.__init__ / .step (Tperiod=None)
# ----------------------------------------------------------------------------
def make_input_mapping_params(key, d_in, n_freq, sigma=2.0, tdiv=2.0,
                              incremental_mask=True):
    # TODO(synk): Tperiod != None frequency snapping branch not implemented.
    Bmat = jax.random.normal(key, (n_freq, d_in), dtype=jnp.float32)
    Bmat = Bmat * (np.pi * sigma / np.sqrt(d_in))
    Bmat = Bmat.at[:, 0].divide(tdiv)
    Bnorms = jnp.linalg.norm(Bmat, axis=1)
    Bmat = Bmat[jnp.argsort(Bnorms), :]
    mask = (jnp.zeros((1, n_freq), dtype=jnp.float32) if incremental_mask
            else jnp.ones((1, n_freq), dtype=jnp.float32))
    return Bmat, mask


def input_mapping_step(mask, progress_percent, n_freq, incremental_mask=True):
    """Mirror of InputMapping.step (host-side glue, not a kernel)."""
    if not incremental_mask:
        return mask
    float_filled = progress_percent * n_freq / 0.7
    int_filled = int(float_filled // 1)
    if int_filled >= n_freq:
        return jnp.ones_like(mask)
    new_mask = np.array(mask)
    new_mask[0, 0:int_filled] = 1.0
    return jnp.asarray(new_mask)


# ----------------------------------------------------------------------------
# Pure-JAX reference for correctness checking
# ----------------------------------------------------------------------------
def input_mapping_ref(xi, Bmat, mask):
    y = jnp.dot(xi, Bmat.T, precision=jax.lax.Precision.HIGHEST)
    return jnp.concatenate([jnp.sin(y) * mask, jnp.cos(y) * mask, xi], axis=-1)


if __name__ == "__main__":
    key = jax.random.PRNGKey(0)
    k_b1, k_x1, k_b2, k_x2 = jax.random.split(key, 4)

    # --- Test 1: small n_freq (unpadded fast path), matches the demo shapes --
    d_in, n_freq, N = 3, 16, 16
    Bmat, mask = make_input_mapping_params(k_b1, d_in, n_freq)
    mask = input_mapping_step(mask, 0.5, n_freq)
    xi = jax.random.normal(k_x1, (N, d_in), dtype=jnp.float32)

    prep = prepare_input_mapping(Bmat, mask)
    out = jax.block_until_ready(input_mapping_apply(xi, prep))
    ref = input_mapping_ref(xi, Bmat, mask)
    assert out.shape == (N, 2 * n_freq + d_in)
    np.testing.assert_allclose(np.asarray(out), np.asarray(ref),
                               rtol=1e-5, atol=1e-5)

    # --- Test 2: padded n_freq, incremental-mask tile skipping, row padding --
    d_in2, n_freq2, N2 = 3, 200, 40
    Bmat2, mask2 = make_input_mapping_params(k_b2, d_in2, n_freq2)
    mask2 = input_mapping_step(mask2, 0.3, n_freq2)
    xi2 = jax.random.normal(k_x2, (N2, d_in2), dtype=jnp.float32)

    prep2 = prepare_input_mapping(Bmat2, mask2)
    out2 = jax.block_until_ready(input_mapping_apply(xi2, prep2))
    ref2 = input_mapping_ref(xi2, Bmat2, mask2)
    assert out2.shape == (N2, 2 * n_freq2 + d_in2)
    np.testing.assert_allclose(np.asarray(out2), np.asarray(ref2),
                               rtol=1e-5, atol=1e-5)

    print("KERNEL_OK")
</pallas_src>

<mosaic_0001>
module attributes {stable_mosaic.version = 11 : i64} {
  func.func @kernel(%arg0: i32, %arg1: memref<1xi32, #tpu.memory_space<smem>>, %arg2: memref<8x3xf32, #tpu.memory_space<vmem>>, %arg3: memref<3x16xf32, #tpu.memory_space<vmem>>, %arg4: memref<1x16xf32, #tpu.memory_space<vmem>>, %arg5: memref<8x35xf32, #tpu.memory_space<vmem>>) attributes {dimension_semantics = [#tpu.dimension_semantics<parallel>], iteration_bounds = array<i64: 2>, scalar_prefetch = 1 : i64, scratch_operands = 0 : i64, tpu.core_type = #tpu.core_type<tc>, window_params = [{transform_indices = @transform_0, window_bounds = array<i64: 8, 3>}, {pipeline_mode = #tpu.pipeline_mode<synchronous>, transform_indices = @transform_1, window_bounds = array<i64: 3, 16>}, {pipeline_mode = #tpu.pipeline_mode<synchronous>, transform_indices = @transform_2, window_bounds = array<i64: 1, 16>}, {transform_indices = @transform_3, window_bounds = array<i64: 8, 35>}]} {
    %c0 = arith.constant 0 : index
    %c0_0 = arith.constant 0 : index
    %0 = vector.load %arg2[%c0, %c0_0] : memref<8x3xf32, #tpu.memory_space<vmem>>, vector<8x3xf32>
    %c0_1 = arith.constant 0 : index
    %1 = memref.load %arg1[%c0_1] : memref<1xi32, #tpu.memory_space<smem>>
    %2 = vector.extract_strided_slice %0 {offsets = [0, 0], sizes = [8, 1], strides = [1, 1]} : vector<8x3xf32> to vector<8x1xf32>
    %3 = vector.shape_cast %2 : vector<8x1xf32> to vector<8x1xf32>
    %4 = vector.broadcast %3 : vector<8x1xf32> to vector<8x16xf32>
    %5 = vector.extract_strided_slice %0 {offsets = [0, 1], sizes = [8, 1], strides = [1, 1]} : vector<8x3xf32> to vector<8x1xf32>
    %6 = vector.shape_cast %5 : vector<8x1xf32> to vector<8x1xf32>
    %7 = vector.broadcast %6 : vector<8x1xf32> to vector<8x16xf32>
    %8 = vector.extract_strided_slice %0 {offsets = [0, 2], sizes = [8, 1], strides = [1, 1]} : vector<8x3xf32> to vector<8x1xf32>
    %9 = vector.shape_cast %8 : vector<8x1xf32> to vector<8x1xf32>
    %10 = vector.broadcast %9 : vector<8x1xf32> to vector<8x16xf32>
    %c0_i32 = arith.constant 0 : i32
    %11 = arith.cmpi sgt, %1, %c0_i32 : i32
    %12 = arith.extui %11 : i1 to i32
    %c0_i32_2 = arith.constant 0 : i32
    %13 = arith.cmpi ne, %12, %c0_i32_2 : i32
    scf.if %13 {
      %c0_6 = arith.constant 0 : index
      %c0_7 = arith.constant 0 : index
      %18 = vector.load %arg3[%c0_6, %c0_7] : memref<3x16xf32, #tpu.memory_space<vmem>>, vector<3x16xf32>
      %19 = vector.extract_strided_slice %18 {offsets = [0, 0], sizes = [1, 16], strides = [1, 1]} : vector<3x16xf32> to vector<1x16xf32>
      %20 = vector.broadcast %19 : vector<1x16xf32> to vector<8x16xf32>
      %21 = arith.mulf %4, %20 : vector<8x16xf32>
      %22 = vector.extract_strided_slice %18 {offsets = [1, 0], sizes = [1, 16], strides = [1, 1]} : vector<3x16xf32> to vector<1x16xf32>
      %23 = vector.broadcast %22 : vector<1x16xf32> to vector<8x16xf32>
      %24 = arith.mulf %7, %23 : vector<8x16xf32>
      %25 = arith.addf %21, %24 : vector<8x16xf32>
      %26 = vector.extract_strided_slice %18 {offsets = [2, 0], sizes = [1, 16], strides = [1, 1]} : vector<3x16xf32> to vector<1x16xf32>
      %27 = vector.broadcast %26 : vector<1x16xf32> to vector<8x16xf32>
      %28 = arith.mulf %10, %27 : vector<8x16xf32>
      %29 = arith.addf %25, %28 : vector<8x16xf32>
      %c0_8 = arith.constant 0 : index
      %c0_9 = arith.constant 0 : index
      %30 = vector.load %arg4[%c0_8, %c0_9] : memref<1x16xf32, #tpu.memory_space<vmem>>, vector<1x16xf32>
      %31 = vector.shape_cast %30 : vector<1x16xf32> to vector<1x16xf32>
      %32 = vector.broadcast %31 : vector<1x16xf32> to vector<8x16xf32>
      %33 = math.sin %29 : vector<8x16xf32>
      %34 = arith.mulf %33, %32 : vector<8x16xf32>
      %c0_10 = arith.constant 0 : index
      %c0_11 = arith.constant 0 : index
      %35 = vector.load %arg5[%c0_10, %c0_11] : memref<8x35xf32, #tpu.memory_space<vmem>>, vector<8x16xf32>
      tpu.vector_store %arg5[%c0_10, %c0_11], %34 {strides = array<i32>} : memref<8x35xf32, #tpu.memory_space<vmem>>, vector<8x16xf32>,
      %36 = math.cos %29 : vector<8x16xf32>
      %37 = arith.mulf %36, %32 : vector<8x16xf32>
      %c0_12 = arith.constant 0 : index
      %c16 = arith.constant 16 : index
      %38 = vector.load %arg5[%c0_12, %c16] : memref<8x35xf32, #tpu.memory_space<vmem>>, vector<8x16xf32>
      tpu.vector_store %arg5[%c0_12, %c16], %37 {strides = array<i32>} : memref<8x35xf32, #tpu.memory_space<vmem>>, vector<8x16xf32>,
    } else {
    }
    %c0_i32_3 = arith.constant 0 : i32
    %14 = arith.cmpi sle, %1, %c0_i32_3 : i32
    %15 = arith.extui %14 : i1 to i32
    %c0_i32_4 = arith.constant 0 : i32
    %16 = arith.cmpi ne, %15, %c0_i32_4 : i32
    scf.if %16 {
      %cst = arith.constant 0.000000e+00 : f32
      %18 = vector.broadcast %cst : f32 to vector<8x16xf32>
      %c0_6 = arith.constant 0 : index
      %c0_7 = arith.constant 0 : index
      %19 = vector.load %arg5[%c0_6, %c0_7] : memref<8x35xf32, #tpu.memory_space<vmem>>, vector<8x16xf32>
      tpu.vector_store %arg5[%c0_6, %c0_7], %18 {strides = array<i32>} : memref<8x35xf32, #tpu.memory_space<vmem>>, vector<8x16xf32>,
      %c0_8 = arith.constant 0 : index
      %c16 = arith.constant 16 : index
      %20 = vector.load %arg5[%c0_8, %c16] : memref<8x35xf32, #tpu.memory_space<vmem>>, vector<8x16xf32>
      tpu.vector_store %arg5[%c0_8, %c16], %18 {strides = array<i32>} : memref<8x35xf32, #tpu.memory_space<vmem>>, vector<8x16xf32>,
    } else {
    }
    %c0_5 = arith.constant 0 : index
    %c32 = arith.constant 32 : index
    %17 = vector.load %arg5[%c0_5, %c32] : memref<8x35xf32, #tpu.memory_space<vmem>>, vector<8x3xf32>
    tpu.vector_store %arg5[%c0_5, %c32], %0 {strides = array<i32>} : memref<8x35xf32, #tpu.memory_space<vmem>>, vector<8x3xf32>,
    return
  }
  func.func @transform_0(%arg0: i32, %arg1: memref<1xi32, #tpu.memory_space<smem>>) -> (i32, i32) {
    %c0_i32 = arith.constant 0 : i32
    %c0_i32_0 = arith.constant 0 : i32
    return %arg0, %c0_i32 : i32, i32
  }
  func.func @transform_1(%arg0: i32, %arg1: memref<1xi32, #tpu.memory_space<smem>>) -> (i32, i32) {
    %c0_i32 = arith.constant 0 : i32
    %c0_i32_0 = arith.constant 0 : i32
    %c0_i32_1 = arith.constant 0 : i32
    return %c0_i32, %c0_i32_0 : i32, i32
  }
  func.func @transform_2(%arg0: i32, %arg1: memref<1xi32, #tpu.memory_space<smem>>) -> (i32, i32) {
    %c0_i32 = arith.constant 0 : i32
    %c0_i32_0 = arith.constant 0 : i32
    %c0_i32_1 = arith.constant 0 : i32
    return %c0_i32, %c0_i32_0 : i32, i32
  }
  func.func @transform_3(%arg0: i32, %arg1: memref<1xi32, #tpu.memory_space<smem>>) -> (i32, i32) {
    %c0_i32 = arith.constant 0 : i32
    %c0_i32_0 = arith.constant 0 : i32
    return %arg0, %c0_i32 : i32, i32
  }
}

</mosaic_0001>

<bundles_post_ra>
// kernel: tpu_custom_call.1
= control target key start
LH: loop header
LB: loop body
LE: loop exit
PB: predicated region body
PF: predicated region fallthrough
CT: control target
= control target key end

     0   :  { %s853_s0 = inlined_call_operand.<no memory space> [shape: s32[1], index: 0, kind: input, shape index: {}]   ;;  %s854_s1 = inlined_call_operand.vmem [shape: f32[16,3], index: 1, kind: input, shape index: {}]   ;;  %s855_s2 = inlined_call_operand.vmem [shape: f32[3,16], index: 2, kind: input, shape index: {}]   ;;  %s856_s3 = inlined_call_operand.vmem [shape: f32[1,16], index: 3, kind: input, shape index: {}]   ;;  %s857_s4 = inlined_call_operand.hbm [shape: f32[16,35], index: 4, kind: output, shape index: {}]  }
   0x1   :  { %9 = sst [smem:[#allocation3]] %s853_s0 }
   0x2   :  { %10 = vsyncpa [#allocation5], 0 }
   0x3   :  { %12 = vsyncpa [#allocation5 + $0x1], 0  ;;  %s704_s17 = smov 0   ;;  %s706_s18 = smov 0  }
   0x4   :  { %s708_s19 = smov 0   ;;  %s710_s20 = smov 0  }
   0x5 LB: > { %s725_s0 = sadd.s32 4294967295, %s661_s20   ;;  %s515_s21 = sadd.s32 4294967294, %s661_s20   ;;  %s661_s20 = sphi %s710_s20, %s863_s20   ;;  %s657_s19 = sphi %s708_s19, %s862_s19   ;;  %s653_s18 = sphi %s706_s18, %s861_s18   ;;  %s649_s17 = sphi %s704_s17, %s860_s17  }
   0x6   : > { %s729_s22 = sadd.s32 1, %s661_s20   ;;  %s93_s23 = sadd.s32 1, %s657_s19 }
   0x7   : > { %s90_s24 = ssub.s32 %s661_s20, %s729_s22  ;;  %p103_p0 = scmp.ne.s32.totalorder %s657_s19, %s653_s18 }
   0x8   : > { %p91_p1 = scmp.eq.s32.totalorder %s90_s24, 0  ;;  %p104_p2 = scmp.eq.s32.totalorder %s725_s0, 1 }
   0x9   : > { %p109_p3 = scmp.ne.s32.totalorder %s653_s18, %s649_s17  ;;  %p110_p4 = scmp.eq.s32.totalorder %s515_s21, 1 }
   0xa   : > { %s740_s25 = scalar_select %p91_p1, %s657_s19, %s93_s23  }
   0xb   : > { %p742_p5 = por %p104_p2, %p103_p0  ;;  %p746_p6 = por %p110_p4, %p109_p3 }
   0xc   : > { %p518_p7 = scmp.ge.s32.totalorder %s661_s20, 1  ;;  %p141_p8 = scmp.lt.s32.totalorder %s661_s20, 3 }
   0xe   : > { %p142_p9 = pnand %p518_p7, %p141_p8 }
   0xf   : > { %p164_p10 = scmp.lt.s32.totalorder (!%p142_p9), %s725_s0, 1  ;;  %v663_v0 = vmov (!%p142_p9), 0   ;;  %v664_v1 = vmov (!%p142_p9), 2   ;;  %s161_s7 = sand.u32 (!%p142_p9), 1, %s653_s18   ;;  %v665_v3 = vmov (!%p142_p9), 1  }
  0x10   : > { %145 = sbr.rel (%p142_p9) target bundleno = 504 (0x1f8), region = 32  ;;  %591 = vset.pattern.permute.xlu0 (!%p142_p9), %v663_v0  ;;  %593 = vset.pattern.permute.xlu1 (!%p142_p9), %v664_v1  ;;  %s519_s8 = sshll.u32 (!%p142_p9), %s161_s7, 3 }
  0x11   : > { %s764_s9 = sld [smem:[#allocation3]] (!%p142_p9)  ;;  %s767_s10 = scalar_lea.vmem (!%p142_p9), [#allocation4], %s519_s8 }
  0x17   : > { %s165_s28 = scalar_select %p164_p10, %s725_s0, 1 }
  0x18   : > { %p521_p11 = scmp.le.s32.totalorder %s764_s9, 0 }
  0x19   : > { %s520_s29 = sshll.u32 %s165_s28, 3  ;;  %v188_v7 = vlaneseq (!%p521_p11)  ;;  %v187_v9 = vld [vmem:[%s855_s2] sm:$0x7] (!%p521_p11)  ;;  %v666_v32 = vmov (!%p521_p11), 683565275   ;;  %s672_s15 = smov (!%p521_p11), 16  }
  0x1a   : > { %s167_s6 = scalar_lea.vmem %s854_s1, %s520_s29  ;;  %v667_v34 = vmov (!%p521_p11), 2475754826   ;;  %v668_v36 = vmov (!%p521_p11), 2131351028   ;;  %v669_v38 = vmov (!%p521_p11), 2102212464  }
  0x1b   : > { %v757_v2 = vld [vmem:[%s167_s6] sm:$0xff]  ;;  %v189_v8 = vshrl.u32 (!%p521_p11), %v188_v7, 7  ;;  %v670_v40 = vmov (!%p521_p11), 920167782   ;;  %v671_v47 = vmov (!%p521_p11), 1326507024  }
  0x1c   : > { %172 = vperm.xlu0 %591, %v757_v2   ;;  %180 = vperm.xlu1 %593, %v757_v2  }
  0x1d   : > { %v190_v10 = vsub.s32 (!%p521_p11), 0, %v189_v8  ;;  %v195_v11 = vsub.s32 (!%p521_p11), 1, %v189_v8  ;;  %v201_v12 = vsub.s32 (!%p521_p11), 2, %v189_v8 }
  0x1f   : > { %v191_v13 = vrot.slane (!%p521_p11), %v187_v9, %v190_v10  ;;  %v196_v14 = vrot.slane (!%p521_p11), %v187_v9, %v195_v11  ;;  %v202_v15 = vrot.slane (!%p521_p11), %v187_v9, %v201_v12 }
  0x20   : > { %592 = vset.pattern.permute.xlu0 %v665_v3 }
  0x21   : > { %176 = vperm.xlu0 %592, %v757_v2  }
  0x25   : > { %594 = vset.pattern.permute.xlu0 %v664_v1 }
  0x9a   : > { %186 = sbr.rel (%p521_p11) target bundleno = 365 (0x16d), region = 36 }
  0x9b   : > { %v173_v4 = vpop.permute.xlu0 %172  ;;  %v181_v5 = vpop.permute.xlu1 %180 }
  0x9c   : > { %v192_v16 = vmul.f32 (!%p521_p11), %v191_v13, %v173_v4  ;;  %v203_v18 = vmul.f32 (!%p521_p11), %v202_v15, %v181_v5 }
  0xa0   : > { %v177_v6 = vpop.permute.xlu0 %176 }
  0xa1   : > { %v197_v17 = vmul.f32 %v196_v14, %v177_v6 }
  0xa3   : > { %v198_v19 = vadd.f32 %v197_v17, %v192_v16 }
  0xa5   : > { %v773_v20 = vadd.f32 %v203_v18, %v198_v19 }
  0xa7   : > { %v215_v21 = vand.u32 2139095040, %v773_v20  ;;  %v212_v23 = vand.u32 2147483647, %v773_v20  ;;  %vm214_vm7 = vcmp.lt.s32.totalorder %v773_v20, 0  ;;  %vm304_vm15 = vweird.f32 %v773_v20 }
  0xa9   : > { %v216_v22 = vshrl.u32 %v215_v21, 23  ;;  %v219_v26 = vand.u32 8388607, %v212_v23  ;;  %vm213_vm8 = vcmp.le.f32.partialorder %v212_v23, 0.7853982 }
  0xab   : > { %v523_v24 = vadd.s32 4294967169, %v216_v22  ;;  %v220_v29 = vor.u32 8388608, %v219_v26 }
  0xad   : > { %v222_v25 = vadd.s32 1, %v523_v24  ;;  %v260_v49 = vshll.u32 %v220_v29, 8 }
  0xaf   : > { %vm223_vm0 = vcmp.gt.s32.totalorder %v222_v25, 0 }
  0xb0   : > { %v224_v27 = vsel %vm223_vm0, %v222_v25, 0  ;;  %vm317_vm0 = vcmask 130048  }
  0xb1   : > { %v226_v28 = vand.u32 31, %v224_v27  ;;  %v225_v30 = vshrl.u32 %v224_v27, 5 }
  0xb3   : > { %v227_v31 = vsub.s32 32, %v226_v28  ;;  %v229_v33 = vshll.u32 %v666_v32, %v226_v28  ;;  %v232_v35 = vshll.u32 %v667_v34, %v226_v28  ;;  %v235_v37 = vshll.u32 %v668_v36, %v226_v28 }
  0xb4   : > { %v238_v39 = vshll.u32 %v669_v38, %v226_v28  ;;  %v241_v41 = vshll.u32 %v670_v40, %v226_v28  ;;  %vm244_vm1 = vcmp.lt.s32.totalorder %v225_v30, 1  ;;  %vm247_vm2 = vcmp.lt.s32.totalorder %v225_v30, 4 }
  0xb5   : > { %v228_v42 = vshrl.u32 %v666_v32, %v227_v31  ;;  %v230_v43 = vshrl.u32 %v667_v34, %v227_v31  ;;  %v233_v44 = vshrl.u32 %v668_v36, %v227_v31  ;;  %v236_v45 = vshrl.u32 %v669_v38, %v227_v31 }
  0xb6   : > { %v239_v46 = vshrl.u32 %v670_v40, %v227_v31  ;;  %v242_v48 = vshrl.u32 %v671_v47, %v227_v31  ;;  %vm245_vm3 = vcmp.lt.s32.totalorder %v225_v30, 2  ;;  %vm246_vm4 = vcmp.lt.s32.totalorder %v225_v30, 3 }
  0xb7   : > { %v231_v50 = vor.u32 %v230_v43, %v229_v33  ;;  %v234_v51 = vor.u32 %v233_v44, %v232_v35  ;;  %v237_v52 = vor.u32 %v236_v45, %v235_v37 }
  0xb8   : > { %v240_v53 = vor.u32 %v239_v46, %v238_v39  ;;  %v243_v54 = vor.u32 %v242_v48, %v241_v41 }
  0xb9   : > { %v248_v55 = vsel %vm244_vm1, %v228_v42, %v231_v50  ;;  %v249_v56 = vsel %vm247_vm2, %v237_v52, 2102212464  ;;  %v252_v57 = vsel %vm244_vm1, %v231_v50, %v234_v51  ;;  %v256_v58 = vsel %vm244_vm1, %v234_v51, %v237_v52 }
  0xba   : > { %v250_v59 = vsel %vm246_vm4, %v234_v51, %v249_v56  ;;  %v253_v60 = vsel %vm247_vm2, %v240_v53, 920167782  ;;  %v257_v61 = vsel %vm247_vm2, %v243_v54, 1326507024  ;;  %vm427_vm1 = vcmask 261248  }
  0xbb   : > { %v254_v62 = vsel %vm246_vm4, %v237_v52, %v253_v60  ;;  %v258_v63 = vsel %vm246_vm4, %v240_v53, %v257_v61  ;;  %v251_v0 = vsel %vm245_vm3, %v248_v55, %v250_v59 }
  0xbc   : > { %v255_v1 = vsel %vm245_vm3, %v252_v57, %v254_v62  ;;  %v259_v3 = vsel %vm245_vm3, %v256_v58, %v258_v63  ;;  %v267_v8 = vmul.u32 %v260_v49, %v251_v0 }
  0xbd   : > { %v779_v4 = vmul.u32.u64.low %v260_v49, %v259_v3  ;;  %v780_v5 = vmul.u32.u64.high %v260_v49, %v259_v3, %v779_v4  ;;  %v782_v6 = vmul.u32.u64.low %v260_v49, %v255_v1  ;;  %v783_v7 = vmul.u32.u64.high %v260_v49, %v255_v1, %v782_v6  ;;  %v522_v49 = vld [vmem:[%s856_s3] ss:$0 sm:$0xff] }
  0xbf   : > { %vm269_vm5 = vc.u32 %v780_v5, %v782_v6  ;;  %v270_v9 = vadd.s32 1, %v783_v7  ;;  %v268_v21 = vadd.s32 %v782_v6, %v780_v5 }
  0xc1   : > { %v271_v10 = vsel %vm269_vm5, %v270_v9, %v783_v7 }
  0xc2   : > { %v272_v11 = vadd.s32 %v271_v10, %v267_v8 }
  0xc4   : > { %v273_v12 = vadd.s32 536870912, %v272_v11 }
  0xc6   : > { %v274_v13 = vshrl.u32 %v273_v12, 30 }
  0xc8   : > { %v275_v14 = vshll.u32 %v274_v13, 30  ;;  %v298_v35 = vsub.s32 4, %v274_v13 }
  0xca   : > { %v276_v15 = vsub.s32 %v272_v11, %v275_v14  ;;  %v299_v38 = vsel %vm214_vm7, %v298_v35, %v274_v13 }
  0xcb   : > { %v301_v40 = vsel %vm213_vm8, 0, %v299_v38 }
  0xcc   : > { %v278_v16 = vsub.s32 0, %v276_v15  ;;  %v305_v41 = vadd.s32 3, %v301_v40  ;;  %v412_v43 = vand.u32 3, %v301_v40 }
  0xce   : > { %v524_v17 = vmin.u32 %v278_v16, %v276_v15  ;;  %v306_v42 = vand.u32 3, %v305_v41  ;;  %vm417_vm10 = vcmp.eq.s32.totalorder %v412_v43, 2  ;;  %vm414_vm12 = vcmp.eq.s32.totalorder %v412_v43, 0 }
  0xcf   : > { %vm413_vm14 = vcmp.lt.s32.totalorder %v412_v43, 2 }
  0xd0   : > { %v280_v18 = vclz %v524_v17  ;;  %vm311_vm9 = vcmp.eq.s32.totalorder %v306_v42, 2  ;;  %vm308_vm11 = vcmp.eq.s32.totalorder %v306_v42, 0  ;;  %vm307_vm13 = vcmp.lt.s32.totalorder %v306_v42, 2 }
  0xd2   : > { %v525_v19 = vadd.s32 4294967294, %v280_v18 }
  0xd4   : > { %vm526_vm6 = vcmp.lt.s32.totalorder %v525_v19, 0 }
  0xd5   : > { %v283_v22 = vsel %vm526_vm6, 0, %v525_v19 }
  0xd6   : > { %v284_v24 = vsub.s32 32, %v283_v22  ;;  %v285_v25 = vshll.u32 %v276_v15, %v283_v22  ;;  %v288_v26 = vsub.s32 4294967266, %v283_v22 }
  0xd8   : > { %v286_v27 = vshrl.u32 %v268_v21, %v284_v24  ;;  %v289_v28 = vadd.s32 127, %v288_v26 }
  0xda   : > { %v287_v29 = vor.u32 %v286_v27, %v285_v25  ;;  %v290_v30 = vshll.u32 %v289_v28, 23 }
  0xdc   : > { %v291_v31 = vor.u32 4788187, %v290_v30  ;;  %v294_v32 = vcvt.s32.f32 %v287_v29 }
  0xde   : > { %v292_v33 = vand.u32 2147483647, %v291_v31 }
  0xe0   : > { %v295_v34 = vmul.f32 %v294_v32, %v292_v33 }
  0xe2   : > { %v296_v36 = vxor.u32 2147483648, %v295_v34 }
  0xe4   : > { %v297_v37 = vsel %vm214_vm7, %v296_v36, %v295_v34 }
  0xe5   : > { %v300_v39 = vsel %vm213_vm8, %v773_v20, %v297_v37 }
  0xe6   : > { %595 = vcosq.f32 %v300_v39 }
  0xe7   : > { %597 = vsinq.f32 %v300_v39 }
  0xf0   : > { %v596_v44 = vpop.eup %595 }
  0xf1   : > { %v598_v45 = vpop.eup %597  ;;  %v312_v46 = vxor.u32 2147483648, %v596_v44 }
  0xf2   : > { %v309_v23 = vxor.u32 2147483648, %v598_v45 }
  0xf3   : > { %v313_v47 = vsel %vm311_vm9, %v312_v46, %v598_v45  ;;  %v419_v48 = vsel %vm417_vm10, %v312_v46, %v598_v45 }
  0xf4   : > { %v310_v50 = vsel %vm308_vm11, %v596_v44, %v309_v23  ;;  %v416_v51 = vsel %vm414_vm12, %v596_v44, %v309_v23 }
  0xf5   : > { %v314_v52 = vsel %vm307_vm13, %v310_v50, %v313_v47  ;;  %v420_v53 = vsel %vm413_vm14, %v416_v51, %v419_v48 }
  0xf6   : > { %v315_v54 = vsel %vm304_vm15, nan, %v314_v52  ;;  %v421_v55 = vsel %vm304_vm15, nan, %v420_v53 }
  0xf7   : > { %v316_v56 = vmul.f32 %v522_v49, %v315_v54  ;;  %v422_v57 = vmul.f32 %v522_v49, %v421_v55 }
  0xf9   : > { %318 = vst.msk [vmem:[%s767_s10] sm:$0xff] %vm317_vm0, %v316_v56  ;;  %424 = vrot.lane.b32.xlu0 %v422_v57, %s672_s15 }
 0x16b   : > { %v425_v20 = vpop.permute.xlu0 %424 }
 0x16c   : > { %428 = vst.msk [vmem:[%s767_s10] sm:$0xff] %vm427_vm1, %v425_v20 }
 0x16d PF: > { %p531_p12 = scmp.gt.s32.totalorder %s764_s9, 0 }
 0x16e   : > { %vm433_vm2 = vcmask (!%p531_p12), 130048   ;;  %vm435_vm3 = vcmask (!%p531_p12), 261248   ;;  %v673_v58 = vmov (!%p531_p12), 0.0  }
 0x16f   : > { %432 = sbr.rel (%p531_p12) target bundleno = 374 (0x176), region = 40  ;;  %434 = vst.msk [vmem:[%s767_s10] sm:$0xff] (!%p531_p12), %vm433_vm2, %v673_v58 }
 0x170   : > { %436 = vst.msk [vmem:[%s767_s10] sm:$0xff] (!%p531_p12), %vm435_vm3, %v673_v58 }
 0x176 PF: > { %s674_s16 = smov 32   ;;  %s533_s21 = sshll.u32 %s725_s0, 7  ;;  %vm440_vm4 = vcmask 285952  }
 0x177   : > { %437 = vrot.lane.b32.xlu0 %v757_v2, %s674_s16  ;;  %s456_s23 = sshll.u32 %s767_s10, 4  ;;  %s808_s29 = scalar_lea.hbm %s857_s4, %s533_s21  ;;  %s810_s23 = int_to_ptr.vmem [resolvable:$true] %s456_s23 }
 0x178   : > { %s443_s30 = scalar_lea.sflag [#allocation5], %s161_s7  ;;  %s599_s5 = scalar_lea.vmem %s810_s23, 128 }
 0x179   : > { %p600_p13 = scmp.ne.s32.totalorder %s810_s23, %s599_s5  ;;  %s675_s0 = smov [#allocation4]  }
 0x17a   : > { %s603_s6 = sshll.u32 %s675_s0, 4  ;;  %s604_s6 = int_to_ptr.vmem [resolvable:$false] %s603_s6 }
 0x17b   : > { %p601_p0 = pnand %p600_p13, %p742_p5  ;;  %s605_s8 = scalar_lea.vmem %s604_s6, 256 }
 0x17c   : > { %p606_p2 = scmp.lt.s32.totalorder %s810_s23, %s604_s6  ;;  %p607_p3 = scmp.lt.s32.totalorder %s605_s8, %s599_s5 }
 0x17d   : > { %p602_p1 = pneg %p601_p0 }
 0x17e   : > { %p608_p4 = por %p607_p3, %p606_p2 }
 0x180   : > { %p609_p7 = pnand %p608_p4, %p602_p1 }
 0x1e9   : > { %v438_v59 = vpop.permute.xlu0 %437 }
 0x1ea   : > { %441 = vst.msk [vmem:[%s767_s10] sm:$0xff] %vm440_vm4, %v438_v59 }
 0x1eb   : > { %612 = shalt.err (!%p609_p7)
}
 0x1ec   : > { %s613_s7 = scalar_lea.hbm %s808_s29, 128  ;;  %s617_s11 = scalar_lea.hbm %s857_s4, 256 }
 0x1ed   : > { %p614_p8 = scmp.ne.s32.totalorder %s808_s29, %s613_s7  ;;  %p618_p11 = scmp.lt.u32.totalorder %s808_s29, %s857_s4 }
 0x1ee   : > { %p619_p12 = scmp.lt.u32.totalorder %s617_s11, %s613_s7  ;;  %p621_p0 = scmp.lt.u32.totalorder %s613_s7, %s808_s29 }
 0x1ef   : > { %p615_p9 = pnand %p614_p8, %p742_p5 }
 0x1f0   : > { %p620_p13 = por %p619_p12, %p618_p11 }
 0x1f1   : > { %p616_p10 = pneg %p615_p9 }
 0x1f2   : > { %p622_p1 = por %p621_p0, %p620_p13 }
 0x1f4   : > { %p623_p2 = pnand %p622_p1, %p616_p10 }
 0x1f6   : > { %626 = shalt.err (!%p623_p2)
}
 0x1f7   : > { %540 = dma.vmem_to_hbm [thread:$0]  (%p742_p5), %s810_s23, 128, %s808_s29, %s443_s30  }
 0x1f8 PF: > { %p546_p3 = scmp.ge.s32.totalorder %s661_s20, 2  ;;  %s468_s14 = sand.u32 1, %s649_s17  }
 0x1f9   : > { %s469_s15 = scalar_lea.sflag [#allocation5], %s468_s14 }
 0x1fa   : > { %p543_p4 = pnand %p546_p3, %p746_p6 }
 0x1fc   : > { %644 = dma.done.wait (!%p543_p4), %s469_s15, 128  }
 0x1fd   : > { %646 = vsyncadd (!%p543_p4), %s469_s15, 4294967168  ;;  %p15_p7 = scmp.ge.s32.totalorder %s729_s22, 4   ;;  %s860_s17 = smov %s653_s18 }
 0x1fe   : > { %s861_s18 = smov %s657_s19  ;;  %s862_s19 = smov %s740_s25 }
 0x1ff   : > { %s863_s20 = smov %s729_s22  ;;  %17 = sbr.rel (!%p15_p7) target bundleno = 5 (0x5), region = 75 }
 0x206   :  { %474 = vsyncpa [#allocation5], 1 }
 0x207   :  { %476 = vsyncpa [#allocation5 + $0x1], 1 }

</bundles_post_ra>
